<compile_context>
chip_gen: v7x
topology: tpu7x:2x2x1
jax: 0.10.0
libtpu: 0.0.40
codegen_flags: <defaults>
</compile_context>

<pallas_src>
import jax
import jax.numpy as jnp
from jax.experimental import pallas as pl
from jax.experimental.pallas import tpu as pltpu


def _round_up(x, m):
    return ((x + m - 1) // m) * m


def _choose_row_tile(M, tm_max):
    """Pick an MXU/layout-friendly row tile (multiple of 16) and grid size."""
    tm_max = max(16, _round_up(tm_max, 16))
    tm_eff = min(tm_max, _round_up(M, 16))
    grid_m = pl.cdiv(M, tm_eff)
    # v7x megacore: the 'parallel' grid axis is sharded across 2 TensorCores;
    # an odd step count gives a ~1.5x imbalance at small grids.  Extra steps
    # cost ~0.35 us each in this mem-bound kernel, so shrink the tile instead.
    if grid_m > 1 and grid_m % 2 == 1:
        tm_eff = _round_up(pl.cdiv(M, grid_m + 1), 16)
        grid_m = pl.cdiv(M, tm_eff)
    return tm_eff, grid_m


def _quantizer_kernel(x_ref, mask_ref, w_in_ref, b_in_ref, w_out_ref, b_out_ref,
                      h_ref, y_ref):
    # x_ref:     (tm, dim)   f32 (cast to the weights' bf16 dtype in-kernel)
    # mask_ref:  (tm, 1)     f32, 1.0 = keep row / 0.0 = zero row
    # w_in_ref:  (dim, cdim) bf16,  b_in_ref:  (1, cdim) f32
    # w_out_ref: (cdim, dim) bf16,  b_out_ref: (1, dim)  f32
    # h_ref:     (tm, cdim)  intermediate_hiddens (bf16 by default)
    # y_ref:     (tm, dim)   quantized_feats      (bf16 by default)
    x = x_ref[...].astype(w_in_ref.dtype)          # in-kernel cast: VPU slack
    h = jnp.dot(x, w_in_ref[...],
                preferred_element_type=jnp.float32) + b_in_ref[...]
    h_ref[...] = h.astype(h_ref.dtype)
    y = jnp.dot(h.astype(w_out_ref.dtype), w_out_ref[...],
                preferred_element_type=jnp.float32) + b_out_ref[...]
    # Exact zeroing of masked rows (NaN/Inf-safe, matches torch y[~mask] = 0).
    y_ref[...] = jnp.where(mask_ref[...] > 0, y, 0.0).astype(y_ref.dtype)


def no_audio_quantizer_forward(z, mask, w_in, b_in, w_out, b_out, *,
                               tm=512,                      # v6e can use 1024
                               compute_dtype=jnp.bfloat16,
                               hiddens_dtype=jnp.bfloat16,
                               out_dtype=jnp.bfloat16):
    """z: (B, L, dim) f32, mask: (B, L) bool. Returns dict like the torch module.

    Weights are (in_features, out_features) so the kernel computes x @ W + b.
    """
    B, L, dim = z.shape
    cdim = w_in.shape[1]
    M = B * L

    tm_eff, grid_m = _choose_row_tile(M, tm)

    # No padding / no output slicing: rows are independent, Pallas masks the
    # ragged last tile's stores, and OOB rows are simply never materialized.
    x = z.reshape(M, dim)                                   # stays f32
    mask_f = mask.reshape(M, 1).astype(jnp.float32)

    # Weights are small & one-time: cast in the wrapper. Biases stay f32.
    w_in_c = w_in.astype(compute_dtype)
    w_out_c = w_out.astype(compute_dtype)
    b_in2 = b_in.reshape(1, cdim).astype(jnp.float32)
    b_out2 = b_out.reshape(1, dim).astype(jnp.float32)

    h_flat, y_flat = pl.pallas_call(
        _quantizer_kernel,
        out_shape=(
            jax.ShapeDtypeStruct((M, cdim), hiddens_dtype),
            jax.ShapeDtypeStruct((M, dim), out_dtype),
        ),
        grid_spec=pltpu.PrefetchScalarGridSpec(
            num_scalar_prefetch=0,
            grid=(grid_m,),
            in_specs=[
                pl.BlockSpec((tm_eff, dim), lambda i: (i, 0)),   # x rows (f32)
                pl.BlockSpec((tm_eff, 1), lambda i: (i, 0)),     # mask rows
                pl.BlockSpec((dim, cdim), lambda i: (0, 0)),     # W_in (resident)
                pl.BlockSpec((1, cdim), lambda i: (0, 0)),       # b_in
                pl.BlockSpec((cdim, dim), lambda i: (0, 0)),     # W_out (resident)
                pl.BlockSpec((1, dim), lambda i: (0, 0)),        # b_out
            ],
            out_specs=[
                pl.BlockSpec((tm_eff, cdim), lambda i: (i, 0)),  # intermediate_hiddens
                pl.BlockSpec((tm_eff, dim), lambda i: (i, 0)),   # quantized_feats
            ],
        ),
        compiler_params=pltpu.CompilerParams(
            dimension_semantics=("parallel",)),
    )(x, mask_f, w_in_c, b_in2, w_out_c, b_out2)

    h = h_flat.reshape(B, L, cdim)
    y = y_flat.reshape(B, L, dim)
    return {
        'quantized_feats': y,
        'quantized_indices': None,
        'commit_loss': 0.0,
        'intermediate_hiddens': h,
    }


if __name__ == "__main__":
    dim, cdim = 256, 128

    key = jax.random.PRNGKey(0)
    k_wi, k_bi, k_wo, k_bo, k_a, k_b = jax.random.split(key, 6)

    # Shared deterministic parameters (PyTorch Linear stores (out,in); we keep (in,out)).
    w_in = jax.random.normal(k_wi, (dim, cdim), dtype=jnp.float32) * 0.02
    b_in = jax.random.normal(k_bi, (cdim,), dtype=jnp.float32) * 0.01
    w_out = jax.random.normal(k_wo, (cdim, dim), dtype=jnp.float32) * 0.02
    b_out = jax.random.normal(k_bo, (dim,), dtype=jnp.float32) * 0.01

    def run_and_check(B, L, seed_key):
        kz, km = jax.random.split(seed_key)
        z = jax.random.normal(kz, (B, L, dim), dtype=jnp.float32)
        mask = jax.random.bernoulli(km, p=0.7, shape=(B, L))

        out = no_audio_quantizer_forward(z, mask, w_in, b_in, w_out, b_out)
        jax.block_until_ready(out['quantized_feats'])
        jax.block_until_ready(out['intermediate_hiddens'])

        # Pure-JAX f32 reference (kernel uses bf16 MXU inputs / bf16 outputs
        # with f32 accumulation -> loose tolerance).
        h_ref = z @ w_in + b_in
        y_ref = h_ref @ w_out + b_out
        y_ref = jnp.where(mask[:, :, None], y_ref, 0.0)
        assert out['intermediate_hiddens'].shape == (B, L, cdim)
        assert out['quantized_feats'].shape == (B, L, dim)
        assert jnp.allclose(out['intermediate_hiddens'].astype(jnp.float32),
                            h_ref, atol=2e-2, rtol=2e-2)
        assert jnp.allclose(out['quantized_feats'].astype(jnp.float32),
                            y_ref, atol=2e-2, rtol=2e-2)
        assert out['quantized_indices'] is None and out['commit_loss'] == 0.0

    # Tiny case: M = 16 -> a single 16-row tile (exercises tile clamping).
    run_and_check(2, 8, k_a)
    # Moderate case: M = 1018 -> grid of 2 x 512-row tiles with a ragged last
    # tile handled by Pallas (no wrapper pad, no output slicing).
    run_and_check(2, 509, k_b)

    print("KERNEL_OK")
</pallas_src>

<mosaic_0001>
module attributes {stable_mosaic.version = 11 : i64} {
  func.func @_quantizer_kernel(%arg0: i32, %arg1: memref<16x256xf32, #tpu.memory_space<vmem>>, %arg2: memref<16x1xf32, #tpu.memory_space<vmem>>, %arg3: memref<256x128xbf16, #tpu.memory_space<vmem>>, %arg4: memref<1x128xf32, #tpu.memory_space<vmem>>, %arg5: memref<128x256xbf16, #tpu.memory_space<vmem>>, %arg6: memref<1x256xf32, #tpu.memory_space<vmem>>, %arg7: memref<16x128xbf16, #tpu.memory_space<vmem>>, %arg8: memref<16x256xbf16, #tpu.memory_space<vmem>>) attributes {dimension_semantics = [#tpu.dimension_semantics<parallel>], iteration_bounds = array<i64: 1>, scalar_prefetch = 0 : i64, scratch_operands = 0 : i64, tpu.core_type = #tpu.core_type<tc>, window_params = [{transform_indices = @transform_0, window_bounds = array<i64: 16, 256>}, {transform_indices = @transform_1, window_bounds = array<i64: 16, 1>}, {pipeline_mode = #tpu.pipeline_mode<synchronous>, transform_indices = @transform_2, window_bounds = array<i64: 256, 128>}, {pipeline_mode = #tpu.pipeline_mode<synchronous>, transform_indices = @transform_3, window_bounds = array<i64: 1, 128>}, {pipeline_mode = #tpu.pipeline_mode<synchronous>, transform_indices = @transform_4, window_bounds = array<i64: 128, 256>}, {pipeline_mode = #tpu.pipeline_mode<synchronous>, transform_indices = @transform_5, window_bounds = array<i64: 1, 256>}, {transform_indices = @transform_6, window_bounds = array<i64: 16, 128>}, {transform_indices = @transform_7, window_bounds = array<i64: 16, 256>}]} {
    %c0 = arith.constant 0 : index
    %c0_0 = arith.constant 0 : index
    %0 = vector.load %arg1[%c0, %c0_0] : memref<16x256xf32, #tpu.memory_space<vmem>>, vector<16x256xf32>
    %1 = arith.truncf %0 : vector<16x256xf32> to vector<16x256xbf16>
    %c0_1 = arith.constant 0 : index
    %c0_2 = arith.constant 0 : index
    %2 = vector.load %arg3[%c0_1, %c0_2] : memref<256x128xbf16, #tpu.memory_space<vmem>>, vector<256x128xbf16>
    %cst = arith.constant dense<0.000000e+00> : vector<16x128xf32>
    %3 = tpu.matmul %1, %2, %cst {dimension_numbers = #tpu.dot_dimension_numbers<[1], [0], [0], [1], [0, 0, 1, 1], [], []>} : vector<16x256xbf16>, vector<256x128xbf16>, vector<16x128xf32> -> vector<16x128xf32>
    %c0_3 = arith.constant 0 : index
    %c0_4 = arith.constant 0 : index
    %4 = vector.load %arg4[%c0_3, %c0_4] : memref<1x128xf32, #tpu.memory_space<vmem>>, vector<1x128xf32>
    %5 = vector.broadcast %4 : vector<1x128xf32> to vector<16x128xf32>
    %6 = arith.addf %3, %5 : vector<16x128xf32>
    %7 = arith.truncf %6 : vector<16x128xf32> to vector<16x128xbf16>
    %c0_5 = arith.constant 0 : index
    %c0_6 = arith.constant 0 : index
    %8 = vector.load %arg7[%c0_5, %c0_6] : memref<16x128xbf16, #tpu.memory_space<vmem>>, vector<16x128xbf16>
    tpu.vector_store %arg7[%c0_5, %c0_6], %7 {strides = array<i32>} : memref<16x128xbf16, #tpu.memory_space<vmem>>, vector<16x128xbf16>,
    %9 = arith.truncf %6 : vector<16x128xf32> to vector<16x128xbf16>
    %c0_7 = arith.constant 0 : index
    %c0_8 = arith.constant 0 : index
    %10 = vector.load %arg5[%c0_7, %c0_8] : memref<128x256xbf16, #tpu.memory_space<vmem>>, vector<128x256xbf16>
    %cst_9 = arith.constant dense<0.000000e+00> : vector<16x256xf32>
    %11 = tpu.matmul %9, %10, %cst_9 {dimension_numbers = #tpu.dot_dimension_numbers<[1], [0], [0], [1], [0, 0, 1, 1], [], []>} : vector<16x128xbf16>, vector<128x256xbf16>, vector<16x256xf32> -> vector<16x256xf32>
    %c0_10 = arith.constant 0 : index
    %c0_11 = arith.constant 0 : index
    %12 = vector.load %arg6[%c0_10, %c0_11] : memref<1x256xf32, #tpu.memory_space<vmem>>, vector<1x256xf32>
    %13 = vector.broadcast %12 : vector<1x256xf32> to vector<16x256xf32>
    %14 = arith.addf %11, %13 : vector<16x256xf32>
    %c0_12 = arith.constant 0 : index
    %c0_13 = arith.constant 0 : index
    %15 = vector.load %arg2[%c0_12, %c0_13] : memref<16x1xf32, #tpu.memory_space<vmem>>, vector<16x1xf32>
    %cst_14 = arith.constant 0.000000e+00 : f32
    %16 = vector.broadcast %cst_14 : f32 to vector<16x1xf32>
    %17 = arith.cmpf ogt, %15, %16 : vector<16x1xf32>
    %cst_15 = arith.constant 0.000000e+00 : f32
    %18 = vector.shape_cast %17 : vector<16x1xi1> to vector<16x1xi1>
    %19 = vector.broadcast %18 : vector<16x1xi1> to vector<16x256xi1>
    %20 = vector.broadcast %cst_15 : f32 to vector<16x256xf32>
    %21 = arith.select %19, %14, %20 : vector<16x256xi1>, vector<16x256xf32>
    %22 = arith.truncf %21 : vector<16x256xf32> to vector<16x256xbf16>
    %c0_16 = arith.constant 0 : index
    %c0_17 = arith.constant 0 : index
    %23 = vector.load %arg8[%c0_16, %c0_17] : memref<16x256xbf16, #tpu.memory_space<vmem>>, vector<16x256xbf16>
    tpu.vector_store %arg8[%c0_16, %c0_17], %22 {strides = array<i32>} : memref<16x256xbf16, #tpu.memory_space<vmem>>, vector<16x256xbf16>,
    return
  }
  func.func @transform_0(%arg0: i32) -> (i32, i32) {
    %c0_i32 = arith.constant 0 : i32
    %c0_i32_0 = arith.constant 0 : i32
    return %arg0, %c0_i32 : i32, i32
  }
  func.func @transform_1(%arg0: i32) -> (i32, i32) {
    %c0_i32 = arith.constant 0 : i32
    %c0_i32_0 = arith.constant 0 : i32
    return %arg0, %c0_i32 : i32, i32
  }
  func.func @transform_2(%arg0: i32) -> (i32, i32) {
    %c0_i32 = arith.constant 0 : i32
    %c0_i32_0 = arith.constant 0 : i32
    %c0_i32_1 = arith.constant 0 : i32
    return %c0_i32, %c0_i32_0 : i32, i32
  }
  func.func @transform_3(%arg0: i32) -> (i32, i32) {
    %c0_i32 = arith.constant 0 : i32
    %c0_i32_0 = arith.constant 0 : i32
    %c0_i32_1 = arith.constant 0 : i32
    return %c0_i32, %c0_i32_0 : i32, i32
  }
  func.func @transform_4(%arg0: i32) -> (i32, i32) {
    %c0_i32 = arith.constant 0 : i32
    %c0_i32_0 = arith.constant 0 : i32
    %c0_i32_1 = arith.constant 0 : i32
    return %c0_i32, %c0_i32_0 : i32, i32
  }
  func.func @transform_5(%arg0: i32) -> (i32, i32) {
    %c0_i32 = arith.constant 0 : i32
    %c0_i32_0 = arith.constant 0 : i32
    %c0_i32_1 = arith.constant 0 : i32
    return %c0_i32, %c0_i32_0 : i32, i32
  }
  func.func @transform_6(%arg0: i32) -> (i32, i32) {
    %c0_i32 = arith.constant 0 : i32
    %c0_i32_0 = arith.constant 0 : i32
    return %arg0, %c0_i32 : i32, i32
  }
  func.func @transform_7(%arg0: i32) -> (i32, i32) {
    %c0_i32 = arith.constant 0 : i32
    %c0_i32_0 = arith.constant 0 : i32
    return %arg0, %c0_i32 : i32, i32
  }
}

</mosaic_0001>

<bundles_post_ra>
// kernel: tpu_custom_call.1
= control target key start
LH: loop header
LB: loop body
LE: loop exit
PB: predicated region body
PF: predicated region fallthrough
CT: control target
= control target key end

     0   :  { %13 = vsyncpa [#allocation3], 0  ;;  %s853_s0 = inlined_call_operand.hbm [shape: f32[16,256], index: 0, kind: input, shape index: {}]   ;;  %s854_s1 = inlined_call_operand.vmem [shape: f32[16,1], index: 1, kind: input, shape index: {}]   ;;  %s855_s2 = inlined_call_operand.hbm [shape: bf16[256,128], index: 2, kind: input, shape index: {}]   ;;  %s856_s3 = inlined_call_operand.vmem [shape: f32[1,128], index: 3, kind: input, shape index: {}]   ;;  %s857_s4 = inlined_call_operand.hbm [shape: bf16[128,256], index: 4, kind: input, shape index: {}]   ;;  %s858_s5 = inlined_call_operand.vmem [shape: f32[1,256], index: 5, kind: input, shape index: {}]   ;;  %s859_s6 = inlined_call_operand.hbm [shape: bf16[16,128], index: 6, kind: output, shape index: {0}]   ;;  %s860_s7 = inlined_call_operand.hbm [shape: bf16[16,256], index: 7, kind: output, shape index: {1}]  }
   0x1   :  { %14 = vsyncpa [#allocation6], 0 }
   0x2   :  { %15 = vsyncpa [#allocation4], 0 }
   0x3   :  { %16 = vsyncpa [#allocation10], 0  ;;  %s717_s24 = smov [#allocation5]   ;;  %s599_s28 = scalar_lea.hbm %s855_s2, 2048 }
   0x4   :  { %s36_s25 = sshll.u32 %s717_s24, 4  ;;  %p600_p0 = scmp.ne.s32.totalorder %s855_s2, %s599_s28  ;;  %s37_s25 = int_to_ptr.vmem [resolvable:$true] %s36_s25 }
   0x5   :  { %p603_p1 = scmp.lt.u32.totalorder %s599_s28, %s855_s2 }
   0x7   :  { %p605_p2 = pnand %p603_p1, %p600_p0 }
   0x9   :  { %608 = shalt.err (!%p605_p2)
}
   0xa   :  { %s609_s10 = scalar_lea.vmem %s37_s25, 2048  ;;  %p614_p4 = scmp.lt.s32.totalorder %s37_s25, %s37_s25 }
   0xb   :  { %p610_p3 = scmp.ne.s32.totalorder %s37_s25, %s609_s10  ;;  %p615_p5 = scmp.lt.s32.totalorder %s609_s10, %s609_s10 }
   0xd   :  { %p616_p6 = por %p615_p5, %p614_p4 }
   0xf   :  { %p617_p7 = pnand %p616_p6, %p610_p3 }
  0x11   :  { %620 = shalt.err (!%p617_p7)
}
  0x12   :  { %s718_s11 = smov 64   ;;  %s719_s12 = smov 4  }
  0x13   :  { %42 = dma.hbm_to_vmem [thread:$0]  %s855_s2, 2048, %s37_s25, [#allocation6], %s718_s11, %s718_s11, %s719_s12  }
  0x14   :  { %s720_s15 = smov [#allocation2]   ;;  %s621_s19 = scalar_lea.hbm %s853_s0, 512 }
  0x15   :  { %s22_s16 = sshll.u32 %s720_s15, 4  ;;  %p622_p8 = scmp.ne.s32.totalorder %s853_s0, %s621_s19  ;;  %s23_s16 = int_to_ptr.vmem [resolvable:$true] %s22_s16 }
  0x16   :  { %p625_p9 = scmp.lt.u32.totalorder %s621_s19, %s853_s0 }
  0x18   :  { %p627_p10 = pnand %p625_p9, %p622_p8 }
  0x1a   :  { %630 = shalt.err (!%p627_p10)
}
  0x1b   :  { %s631_s24 = scalar_lea.vmem %s23_s16, 512  ;;  %p636_p12 = scmp.lt.s32.totalorder %s23_s16, %s23_s16 }
  0x1c   :  { %p632_p11 = scmp.ne.s32.totalorder %s23_s16, %s631_s24  ;;  %p637_p13 = scmp.lt.s32.totalorder %s631_s24, %s631_s24 }
  0x1e   :  { %p638_p0 = por %p637_p13, %p636_p12 }
  0x20   :  { %p639_p1 = pnand %p638_p0, %p632_p11 }
  0x22   :  { %642 = shalt.err (!%p639_p1)
}
  0x23   :  { %s721_s2 = smov 256   ;;  %s722_s25 = smov 16  }
  0x24   :  { %28 = dma.hbm_to_vmem [thread:$0]  %s853_s0, 512, %s23_s16, [#allocation3], %s721_s2, %s721_s2, %s722_s25  }
  0x25   :  { %s723_s28 = smov [#allocation7]   ;;  %s643_s9 = scalar_lea.hbm %s857_s4, 2048 }
  0x26   :  { %s50_s29 = sshll.u32 %s723_s28, 4  ;;  %p644_p2 = scmp.ne.s32.totalorder %s857_s4, %s643_s9  ;;  %s51_s29 = int_to_ptr.vmem [resolvable:$true] %s50_s29 }
  0x27   :  { %p647_p3 = scmp.lt.u32.totalorder %s643_s9, %s857_s4 }
  0x29   :  { %p649_p4 = pnand %p647_p3, %p644_p2 }
  0x2b   :  { %652 = shalt.err (!%p649_p4)
}
  0x2c   :  { %s653_s17 = scalar_lea.vmem %s51_s29, 2048  ;;  %p658_p6 = scmp.lt.s32.totalorder %s51_s29, %s51_s29 }
  0x2d   :  { %p654_p5 = scmp.ne.s32.totalorder %s51_s29, %s653_s17  ;;  %p659_p7 = scmp.lt.s32.totalorder %s653_s17, %s653_s17 }
  0x2f   :  { %p660_p8 = por %p659_p7, %p658_p6 }
  0x31   :  { %p661_p9 = pnand %p660_p8, %p654_p5 }
  0x33   :  { %664 = shalt.err (!%p661_p9)
}
  0x34   :  { %s724_s0 = smov 128   ;;  %s725_s16 = smov 8  }
  0x35   :  { %56 = dma.hbm_to_vmem [thread:$0]  %s857_s4, 2048, %s51_s29, [#allocation6], %s724_s0, %s724_s0, %s725_s16  }
  0x36   :  { %709 = dma.done.wait [#allocation3], 512  }
  0x37   :  { %710 = vsyncadd [#allocation3], 4294966784 }
  0x38   :  { %711 = dma.done.wait [#allocation6], 4096  }
  0x39   :  { %712 = vsyncadd [#allocation6], 4294963200  ;;  %v559_v0 = vld [vmem:[#allocation5 + $0x40] sm:$0xff]   ;;  %v561_v2 = vld [vmem:[#allocation5 + $0x48] sm:$0xff]   ;;  %v726_v38 = vmov 0  }
  0x3a   :  { %v560_v1 = vld [vmem:[#allocation5] sm:$0xff]   ;;  %524 = vmatprep.subr.bf16.mxu0 %v559_v0  ;;  %v562_v3 = vld [vmem:[#allocation5 + $0x8] sm:$0xff]   ;;  %v563_v4 = vld [vmem:[#allocation5 + $0x50] sm:$0xff]   ;;  %401 = vmatprep.mubr.bf16.mxu1 %v726_v38 }
  0x3b   :  { %525 = vmatpush3.bf16.msra.mxu0 %v560_v1  ;;  %v564_v5 = vld [vmem:[#allocation5 + $0x10] sm:$0xff]   ;;  %v565_v6 = vld [vmem:[#allocation5 + $0x58] sm:$0xff]   ;;  %v567_v8 = vld [vmem:[#allocation5 + $0x60] sm:$0xff]   ;;  %558 = vset.pattern.permute.xlu0 %v726_v38 }
  0x3c   :  { %526 = vmatprep.subr.bf16.mxu0 %v561_v2  ;;  %v566_v7 = vld [vmem:[#allocation5 + $0x18] sm:$0xff]   ;;  %v568_v9 = vld [vmem:[#allocation5 + $0x20] sm:$0xff]   ;;  %v569_v10 = vld [vmem:[#allocation5 + $0x68] sm:$0xff]  }
  0x3d   :  { %v70_v11 = vld [vmem:[#allocation2 + $0x8] sm:$0xff]  ;;  %v72_v12 = vld [vmem:[#allocation2 + $0x18] sm:$0xff]  ;;  %v571_v18 = vld [vmem:[#allocation5 + $0x70] sm:$0xff]  }
  0x3e   :  { %v74_v13 = vpack.c.bf16 %v72_v12, %v70_v11  ;;  %v575_v14 = vld [vmem:[#allocation7 + $0x4] ss:$8 sps:$4 sm:$0xff]   ;;  %v577_v15 = vld [vmem:[#allocation7] ss:$8 sps:$4 sm:$0xff]   ;;  %v578_v17 = vld [vmem:[#allocation7 + $0x14] ss:$8 sps:$4 sm:$0xff]  }
  0x3f   :  { %527 = vmatpush3.bf16.msra.mxu0 %v562_v3  ;;  %v570_v16 = vld [vmem:[#allocation5 + $0x28] sm:$0xff]   ;;  %369 = vmatprep.subr.bf16.mxu1 %v575_v14  ;;  %v580_v19 = vld [vmem:[#allocation7 + $0x10] ss:$8 sps:$4 sm:$0xff]   ;;  %v584_v24 = vld [vmem:[#allocation7 + $0x34] ss:$8 sps:$4 sm:$0xff]  }
  0x40   :  { %528 = vmatprep.subr.bf16.mxu0 %v563_v4  ;;  %242 = vmatprep.mubr.bf16.mxu0 %v74_v13  ;;  %v581_v20 = vld [vmem:[#allocation7 + $0x24] ss:$8 sps:$4 sm:$0xff]   ;;  %v572_v21 = vld [vmem:[#allocation5 + $0x30] sm:$0xff]   ;;  %v573_v22 = vld [vmem:[#allocation5 + $0x78] sm:$0xff]  }
  0x41   :  { %370 = vmatpush1.bf16.msra.mxu1 %v577_v15  ;;  %v583_v23 = vld [vmem:[#allocation7 + $0x20] ss:$8 sps:$4 sm:$0xff]   ;;  %v574_v25 = vld [vmem:[#allocation5 + $0x38] sm:$0xff]   ;;  %v71_v27 = vld [vmem:[#allocation2 + $0x10] sm:$0xff] }
  0x42   :  { %371 = vmatprep.subr.bf16.mxu1 %v578_v17  ;;  %v69_v26 = vld [vmem:[#allocation2] sm:$0xff]  ;;  %v586_v28 = vld [vmem:[#allocation7 + $0x30] ss:$8 sps:$4 sm:$0xff]   ;;  %v590_v32 = vld [vmem:[#allocation7 + $0x54] ss:$8 sps:$4 sm:$0xff]  }
  0x43   :  { %529 = vmatpush3.bf16.msra.mxu0 %v564_v5  ;;  %v73_v29 = vpack.c.bf16 %v71_v27, %v69_v26  ;;  %v587_v30 = vld [vmem:[#allocation7 + $0x44] ss:$8 sps:$4 sm:$0xff]   ;;  %v589_v31 = vld [vmem:[#allocation7 + $0x40] ss:$8 sps:$4 sm:$0xff]   ;;  %v592_v33 = vld [vmem:[#allocation7 + $0x50] ss:$8 sps:$4 sm:$0xff]  }
  0x44   :  { %530 = vmatprep.subr.bf16.mxu0 %v565_v6  ;;  %v593_v34 = vld [vmem:[#allocation7 + $0x64] ss:$8 sps:$4 sm:$0xff]   ;;  %v595_v35 = vld [vmem:[#allocation7 + $0x60] ss:$8 sps:$4 sm:$0xff]   ;;  %v596_v36 = vld [vmem:[#allocation7 + $0x74] ss:$8 sps:$4 sm:$0xff]  }
  0x45   :  { %372 = vmatpush1.bf16.msra.mxu1 %v580_v19  ;;  %v598_v37 = vld [vmem:[#allocation7 + $0x70] ss:$8 sps:$4 sm:$0xff]   ;;  %v412_v39 = vld [vmem:[%s854_s1] sm:$0xff]  ;;  %v413_v40 = vld [vmem:[%s854_s1 + $0x8] sm:$0xff]  ;;  %s727_s1 = smov [#allocation8]  }
  0x46   :  { %373 = vmatprep.subr.bf16.mxu1 %v581_v20  ;;  %vm414_vm0 = vcmp.gt.f32.partialorder %v412_v39, 0.0  ;;  %vm415_vm1 = vcmp.gt.f32.partialorder %v413_v40, 0.0  ;;  %v478_v47 = vld [vmem:[%s856_s3] ss:$0 sm:$0xff]  ;;  %s449_s2 = sshll.u32 %s727_s1, 4  ;;  %s450_s2 = int_to_ptr.vmem [resolvable:$true] %s449_s2 }
  0x47   :  { %531 = vmatpush3.bf16.msra.mxu0 %v566_v7  ;;  %v416_v41 = vsel %vm414_vm0, 1, %v726_v38  ;;  %v417_v42 = vsel %vm415_vm1, 1, %v726_v38  ;;  %s665_s25 = scalar_lea.vmem %s450_s2, 128  ;;  %p670_p11 = scmp.lt.s32.totalorder %s450_s2, %s450_s2 }
  0x48   :  { %532 = vmatprep.subr.bf16.mxu0 %v567_v8  ;;  %419 = vperm.xlu0 %558, %v416_v41   ;;  %p666_p10 = scmp.ne.s32.totalorder %s450_s2, %s665_s25  ;;  %p671_p12 = scmp.lt.s32.totalorder %s665_s25, %s665_s25 }
  0x49   :  { %374 = vmatpush1.bf16.msra.mxu1 %v583_v23 }
  0x4a   :  { %375 = vmatprep.subr.bf16.mxu1 %v584_v24  ;;  %p672_p13 = por %p671_p12, %p670_p11 }
  0x4b   :  { %533 = vmatpush3.bf16.msra.mxu0 %v568_v9 }
  0x4c   :  { %534 = vmatprep.subr.bf16.mxu0 %v569_v10  ;;  %422 = vperm.xlu0 %558, %v417_v42   ;;  %p673_p0 = pnand %p672_p13, %p666_p10 }
  0x4d   :  { %376 = vmatpush1.bf16.msra.mxu1 %v586_v28 }
  0x4e   :  { %377 = vmatprep.subr.bf16.mxu1 %v587_v30 }
  0x4f   :  { %535 = vmatpush3.bf16.msra.mxu0 %v570_v16 }
  0x50   :  { %536 = vmatprep.subr.bf16.mxu0 %v571_v18 }
  0x51   :  { %378 = vmatpush1.bf16.msra.mxu1 %v589_v31 }
  0x52   :  { %379 = vmatprep.subr.bf16.mxu1 %v590_v32 }
  0x53   :  { %537 = vmatpush3.bf16.msra.mxu0 %v572_v21 }
  0x54   :  { %538 = vmatprep.subr.bf16.mxu0 %v573_v22 }
  0x55   :  { %380 = vmatpush1.bf16.msra.mxu1 %v592_v33 }
  0x56   :  { %381 = vmatprep.subr.bf16.mxu1 %v593_v34 }
  0x57   :  { %539 = vmatpush3.bf16.msra.mxu0 %v574_v25 }
  0x59   :  { %382 = vmatpush1.bf16.msra.mxu1 %v595_v35 }
  0x5a   :  { %243 = vmatmul.mubr.bf16.vlgmr.msra.gmra.mrb[0].mxu0 %v73_v29  ;;  %383 = vmatprep.subr.bf16.mxu1 %v596_v36 }
  0x5d   :  { %384 = vmatpush1.bf16.msra.mxu1 %v598_v37 }
 0x12d   :  { %v540_v43 = vpop.f32.mrb[0].mxu0 }
 0x12e   :  { %v541_v44 = vpop.f32.mrb[1].mxu0 }
 0x12f   :  { %v542_v45 = vadd.f32 %v541_v44, %v540_v43  ;;  %v543_v46 = vpop.f32.mrb[2].mxu0 }
 0x130   :  { %v544_v48 = vpop.f32.mrb[3].mxu0 }
 0x131   :  { %v545_v49 = vadd.f32 %v544_v48, %v543_v46  ;;  %v245_v50 = vadd.f32 %v542_v45, %v478_v47 }
 0x133   :  { %v248_v51 = vadd.f32 %v545_v49, %v478_v47 }
 0x135   :  { %v251_v52 = vpack.c.bf16 %v248_v51, %v245_v50 }
 0x137   :  { %402 = vmatmul.mubr.bf16.vlgmr.msra.gmra.mrb[0].mxu1 %v251_v52  ;;  %523 = vst [vmem:[#allocation8] sm:$0xff] %v251_v52  }
 0x138   :  { %676 = shalt.err (!%p673_p0)
}
 0x139   :  { %s677_s3 = scalar_lea.hbm %s859_s6, 128 }
 0x13a   :  { %p678_p1 = scmp.ne.s32.totalorder %s859_s6, %s677_s3  ;;  %p681_p2 = scmp.lt.u32.totalorder %s677_s3, %s859_s6 }
 0x13c   :  { %p683_p3 = pnand %p681_p2, %p678_p1 }
 0x13e   :  { %686 = shalt.err (!%p683_p3)
}
 0x13f   :  { %455 = dma.vmem_to_hbm [thread:$0]  %s450_s2, 128, %s859_s6, [#allocation4], %s718_s11, %s718_s11, %s719_s12   ;;  %v279_v53 = vlaneseq  ;;  %v420_v58 = vpop.permute.xlu0 %419 }
 0x140   :  { %v277_v56 = vld [vmem:[%s858_s5] sm:$0x3]  ;;  %vm424_vm2 = vcmp.eq.s32.totalorder %v420_v58, 1  ;;  %s728_s6 = smov [#allocation9]  }
 0x141   :  { %v280_v54 = vshrl.u32 %v279_v53, 7  ;;  %s461_s11 = sshll.u32 %s728_s6, 4  ;;  %s462_s11 = int_to_ptr.vmem [resolvable:$true] %s461_s11 }
 0x142   :  { %s687_s5 = scalar_lea.vmem %s462_s11, 256  ;;  %p692_p5 = scmp.lt.s32.totalorder %s462_s11, %s462_s11 }
 0x143   :  { %v281_v55 = vsub.s32 0, %v280_v54  ;;  %v285_v57 = vsub.s32 1, %v280_v54  ;;  %v423_v62 = vpop.permute.xlu0 %422  ;;  %p688_p4 = scmp.ne.s32.totalorder %s462_s11, %s687_s5  ;;  %p693_p6 = scmp.lt.s32.totalorder %s687_s5, %s687_s5 }
 0x144   :  { %vm425_vm3 = vcmp.eq.s32.totalorder %v423_v62, 1 }
 0x145   :  { %v282_v59 = vrot.slane %v277_v56, %v281_v55  ;;  %v286_v60 = vrot.slane %v277_v56, %v285_v57  ;;  %p694_p7 = por %p693_p6, %p692_p5 }
 0x147   :  { %p695_p8 = pnand %p694_p7, %p688_p4 }
 0x20a   :  { %v403_v61 = vpop.f32.mrb[0].mxu1 }
 0x20b   :  { %v404_v63 = vadd.f32 %v403_v61, %v282_v59  ;;  %v405_v0 = vpop.f32.mrb[1].mxu1 }
 0x20c   :  { %v406_v1 = vadd.f32 %v405_v0, %v286_v60  ;;  %v407_v2 = vpop.f32.mrb[2].mxu1 }
 0x20d   :  { %v426_v3 = vsel %vm424_vm2, %v404_v63, 0.0  ;;  %v408_v4 = vadd.f32 %v407_v2, %v282_v59  ;;  %v409_v5 = vpop.f32.mrb[3].mxu1 }
 0x20e   :  { %v427_v6 = vsel %vm424_vm2, %v406_v1, 0.0  ;;  %v410_v7 = vadd.f32 %v409_v5, %v286_v60 }
 0x20f   :  { %v517_v8 = vpack.c.bf16 %v427_v6, %v426_v3  ;;  %v428_v9 = vsel %vm425_vm3, %v408_v4, 0.0 }
 0x210   :  { %v429_v10 = vsel %vm425_vm3, %v410_v7, 0.0 }
 0x211   :  { %442 = vst [vmem:[#allocation9] sm:$0xff] %v517_v8  ;;  %v518_v11 = vpack.c.bf16 %v429_v10, %v428_v9 }
 0x213   :  { %443 = vst [vmem:[#allocation9 + $0x8] sm:$0xff] %v518_v11 }
 0x214   :  { %698 = shalt.err (!%p695_p8)
}
 0x215   :  { %s699_s17 = scalar_lea.hbm %s860_s7, 256 }
 0x216   :  { %p700_p9 = scmp.ne.s32.totalorder %s860_s7, %s699_s17  ;;  %p703_p10 = scmp.lt.u32.totalorder %s699_s17, %s860_s7 }
 0x218   :  { %p705_p11 = pnand %p703_p10, %p700_p9 }
 0x21a   :  { %708 = shalt.err (!%p705_p11)
}
 0x21b   :  { %467 = dma.vmem_to_hbm [thread:$0]  %s462_s11, 256, %s860_s7, [#allocation10], %s724_s0, %s724_s0, %s725_s16  }
 0x21c   :  { %713 = dma.done.wait [#allocation4], 128  }
 0x21d   :  { %714 = vsyncadd [#allocation4], 4294967168 }
 0x21e   :  { %715 = dma.done.wait [#allocation10], 256  }
 0x21f   :  { %716 = vsyncadd [#allocation10], 4294967040 }
 0x220   :  { %474 = vsyncpa [#allocation3], 1 }
 0x221   :  { %475 = vsyncpa [#allocation6], 1 }
 0x222   :  { %476 = vsyncpa [#allocation4], 1 }
 0x223   :  { %477 = vsyncpa [#allocation10], 1 }

</bundles_post_ra>
